<compile_context>
chip_gen: v7x
topology: tpu7x:2x2x1
jax: 0.10.0
libtpu: 0.0.40
codegen_flags: <defaults>
</compile_context>

<pallas_src>
from functools import partial

import jax
import jax.numpy as jnp
from jax.experimental import pallas as pl
from jax.experimental.pallas import tpu as pltpu

D_IN = 28 * 28        # 784 (full-dim last-axis block; no 896 padding needed)
D_H1, D_H2, D_H3 = 512, 256, 128
D_OUT = 10
D_OUT_PAD = 128       # lane-dense output width
MAX_TILE_B = 1024     # up to 1024 rows / grid step


def mlp_mnist_kernel(x_ref,
                     w1_ref, b1_ref,
                     w2_ref, b2_ref,
                     w3_ref, b3_ref,
                     w4_ref, b4_ref,
                     o_ref):
    # x arrives as f32 straight from HBM; cast to bf16 in VMEM for the MXU.
    x = x_ref[...].astype(jnp.bfloat16)
    # fc1 + relu: bf16 MXU operands, f32 accumulate, f32 epilogue.
    h = jnp.dot(x, w1_ref[...], preferred_element_type=jnp.float32)
    h = jnp.maximum(h + b1_ref[...], 0.0).astype(jnp.bfloat16)
    # fc2 + relu
    h = jnp.dot(h, w2_ref[...], preferred_element_type=jnp.float32)
    h = jnp.maximum(h + b2_ref[...], 0.0).astype(jnp.bfloat16)
    # fc3 + relu
    h = jnp.dot(h, w3_ref[...], preferred_element_type=jnp.float32)
    h = jnp.maximum(h + b3_ref[...], 0.0).astype(jnp.bfloat16)
    # fc4 (no activation); lane-dense (tile_b, 128) bf16 store.
    h = jnp.dot(h, w4_ref[...], preferred_element_type=jnp.float32)
    o_ref[...] = (h + b4_ref[...]).astype(o_ref.dtype)


def _round_up(x, m):
    return (x + m - 1) // m * m


def _pick_tile_b(batch, max_tile_b):
    # Big tiles amortize per-step pipeline overhead; aim for >= 2 grid steps
    # when batch > 128 so both v7x TensorCores get work; never let a block
    # exceed the sublane-rounded batch.
    tile = min(max_tile_b, max(128, _round_up(pl.cdiv(batch, 2), 128)))
    tile = min(tile, _round_up(batch, 8))
    return max(tile, 8)


@partial(jax.jit, static_argnames=("max_tile_b",))
def mlp_mnist_forward(x, kparams, max_tile_b=MAX_TILE_B):
    """x: (B, 1, 28, 28) or (B, 784) float32. kparams: from prepare_params."""
    B = x.shape[0]
    x2d = x.reshape(B, D_IN).astype(jnp.float32)   # metadata-only under jit

    tile_b = _pick_tile_b(B, max_tile_b)
    grid = (pl.cdiv(B, tile_b),)                   # ragged last block is masked

    in_specs = [
        # activations: tiled over the batch grid axis, full 784-wide rows
        pl.BlockSpec((tile_b, D_IN), lambda i: (i, 0)),
        # weights / biases: constant block index -> DMA'd once, VMEM-resident
        pl.BlockSpec((D_IN, D_H1), lambda i: (0, 0)),
        pl.BlockSpec((1, D_H1), lambda i: (0, 0)),
        pl.BlockSpec((D_H1, D_H2), lambda i: (0, 0)),
        pl.BlockSpec((1, D_H2), lambda i: (0, 0)),
        pl.BlockSpec((D_H2, D_H3), lambda i: (0, 0)),
        pl.BlockSpec((1, D_H3), lambda i: (0, 0)),
        pl.BlockSpec((D_H3, D_OUT_PAD), lambda i: (0, 0)),
        pl.BlockSpec((1, D_OUT_PAD), lambda i: (0, 0)),
    ]
    out_spec = pl.BlockSpec((tile_b, D_OUT_PAD), lambda i: (i, 0))

    flops = 2 * B * (D_IN * D_H1 + D_H1 * D_H2 + D_H2 * D_H3
                     + D_H3 * D_OUT_PAD)
    weight_bytes = 2 * (D_IN * D_H1 + D_H1 * D_H2 + D_H2 * D_H3
                        + D_H3 * D_OUT_PAD)
    bytes_accessed = (B * D_IN * 4            # x read (f32)
                      + weight_bytes          # bf16 weights
                      + B * D_OUT_PAD * 2     # bf16 output
                      + 4 * (D_H1 + D_H2 + D_H3 + D_OUT_PAD))

    out = pl.pallas_call(
        mlp_mnist_kernel,
        out_shape=jax.ShapeDtypeStruct((B, D_OUT_PAD), jnp.bfloat16),
        grid=grid,
        in_specs=in_specs,
        out_specs=out_spec,
        compiler_params=pltpu.CompilerParams(
            dimension_semantics=("parallel",),
        ),
        cost_estimate=pl.CostEstimate(
            flops=flops, transcendentals=0, bytes_accessed=bytes_accessed),
    )(
        x2d,
        kparams["w1"], kparams["b1"],
        kparams["w2"], kparams["b2"],
        kparams["w3"], kparams["b3"],
        kparams["w4"], kparams["b4"],
    )
    return out[:, :D_OUT].astype(jnp.float32)


def init_params(key):
    """f32 params mimicking torch.nn.Linear's U(-1/sqrt(fan_in), ...).
    Weights stored transposed: (in_features, out_features)."""
    dims = [(D_IN, D_H1), (D_H1, D_H2), (D_H2, D_H3), (D_H3, D_OUT)]
    params = {}
    for idx, (fan_in, fan_out) in enumerate(dims, start=1):
        key, kw, kb = jax.random.split(key, 3)
        bound = 1.0 / jnp.sqrt(jnp.float32(fan_in))
        params[f"w{idx}"] = jax.random.uniform(
            kw, (fan_in, fan_out), jnp.float32, minval=-bound, maxval=bound)
        params[f"b{idx}"] = jax.random.uniform(
            kb, (1, fan_out), jnp.float32, minval=-bound, maxval=bound)
    return params


def prepare_params(p):
    """Kernel-side params: bf16 weights (prepared once, reused across calls);
    only the final layer is lane-padded (10 -> 128). Biases stay f32."""
    kp = {}
    kp["w1"] = p["w1"].astype(jnp.bfloat16)
    kp["b1"] = p["b1"].astype(jnp.float32)
    kp["w2"] = p["w2"].astype(jnp.bfloat16)
    kp["b2"] = p["b2"].astype(jnp.float32)
    kp["w3"] = p["w3"].astype(jnp.bfloat16)
    kp["b3"] = p["b3"].astype(jnp.float32)
    kp["w4"] = jnp.pad(p["w4"], ((0, 0), (0, D_OUT_PAD - D_OUT))).astype(jnp.bfloat16)
    kp["b4"] = jnp.pad(p["b4"], ((0, 0), (0, D_OUT_PAD - D_OUT))).astype(jnp.float32)
    return kp


def reference_forward(x, params):
    """Pure-JAX f32 reference of the PyTorch forward."""
    h = x.reshape(x.shape[0], -1)
    h = jnp.maximum(h @ params["w1"] + params["b1"], 0.0)
    h = jnp.maximum(h @ params["w2"] + params["b2"], 0.0)
    h = jnp.maximum(h @ params["w3"] + params["b3"], 0.0)
    return h @ params["w4"] + params["b4"]


if __name__ == "__main__":
    key = jax.random.PRNGKey(0)
    key, kx = jax.random.split(key)

    params = init_params(key)
    kparams = prepare_params(params)

    # Small batch (single grid step).
    B = 8
    x = jax.random.normal(kx, (B, 1, 28, 28), dtype=jnp.float32)
    out = jax.block_until_ready(mlp_mnist_forward(x, kparams))
    ref = reference_forward(x, params)
    assert out.shape == (B, 10)
    assert jnp.allclose(out, ref, atol=4e-2, rtol=4e-2)

    # Larger, ragged batch exercising multiple pipelined grid steps and the
    # masked partial last block.
    key, kx2 = jax.random.split(key)
    B2 = 300
    x2 = jax.random.normal(kx2, (B2, 1, 28, 28), dtype=jnp.float32)
    out2 = jax.block_until_ready(mlp_mnist_forward(x2, kparams))
    ref2 = reference_forward(x2, params)
    assert out2.shape == (B2, 10)
    assert jnp.allclose(out2, ref2, atol=4e-2, rtol=4e-2)

    print("KERNEL_OK")
</pallas_src>

<mosaic_0001>
module attributes {stable_mosaic.version = 11 : i64} {
  func.func @mlp_mnist_kernel(%arg0: i32, %arg1: memref<8x784xf32, #tpu.memory_space<vmem>>, %arg2: memref<784x512xbf16, #tpu.memory_space<vmem>>, %arg3: memref<1x512xf32, #tpu.memory_space<vmem>>, %arg4: memref<512x256xbf16, #tpu.memory_space<vmem>>, %arg5: memref<1x256xf32, #tpu.memory_space<vmem>>, %arg6: memref<256x128xbf16, #tpu.memory_space<vmem>>, %arg7: memref<1x128xf32, #tpu.memory_space<vmem>>, %arg8: memref<128x128xbf16, #tpu.memory_space<vmem>>, %arg9: memref<1x128xf32, #tpu.memory_space<vmem>>, %arg10: memref<8x128xbf16, #tpu.memory_space<vmem>>) attributes {dimension_semantics = [#tpu.dimension_semantics<parallel>], iteration_bounds = array<i64: 1>, scalar_prefetch = 0 : i64, scratch_operands = 0 : i64, tpu.core_type = #tpu.core_type<tc>, window_params = [{transform_indices = @transform_0, window_bounds = array<i64: 8, 784>}, {pipeline_mode = #tpu.pipeline_mode<synchronous>, transform_indices = @transform_1, window_bounds = array<i64: 784, 512>}, {pipeline_mode = #tpu.pipeline_mode<synchronous>, transform_indices = @transform_2, window_bounds = array<i64: 1, 512>}, {pipeline_mode = #tpu.pipeline_mode<synchronous>, transform_indices = @transform_3, window_bounds = array<i64: 512, 256>}, {pipeline_mode = #tpu.pipeline_mode<synchronous>, transform_indices = @transform_4, window_bounds = array<i64: 1, 256>}, {pipeline_mode = #tpu.pipeline_mode<synchronous>, transform_indices = @transform_5, window_bounds = array<i64: 256, 128>}, {pipeline_mode = #tpu.pipeline_mode<synchronous>, transform_indices = @transform_6, window_bounds = array<i64: 1, 128>}, {pipeline_mode = #tpu.pipeline_mode<synchronous>, transform_indices = @transform_7, window_bounds = array<i64: 128, 128>}, {pipeline_mode = #tpu.pipeline_mode<synchronous>, transform_indices = @transform_8, window_bounds = array<i64: 1, 128>}, {transform_indices = @transform_9, window_bounds = array<i64: 8, 128>}]} {
    %c0 = arith.constant 0 : index
    %c0_0 = arith.constant 0 : index
    %0 = vector.load %arg1[%c0, %c0_0] : memref<8x784xf32, #tpu.memory_space<vmem>>, vector<8x784xf32>
    %1 = arith.truncf %0 : vector<8x784xf32> to vector<8x784xbf16>
    %c0_1 = arith.constant 0 : index
    %c0_2 = arith.constant 0 : index
    %2 = vector.load %arg2[%c0_1, %c0_2] : memref<784x512xbf16, #tpu.memory_space<vmem>>, vector<784x512xbf16>
    %cst = arith.constant dense<0.000000e+00> : vector<8x512xf32>
    %3 = tpu.matmul %1, %2, %cst {dimension_numbers = #tpu.dot_dimension_numbers<[1], [0], [0], [1], [0, 0, 1, 1], [], []>} : vector<8x784xbf16>, vector<784x512xbf16>, vector<8x512xf32> -> vector<8x512xf32>
    %c0_3 = arith.constant 0 : index
    %c0_4 = arith.constant 0 : index
    %4 = vector.load %arg3[%c0_3, %c0_4] : memref<1x512xf32, #tpu.memory_space<vmem>>, vector<1x512xf32>
    %5 = vector.broadcast %4 : vector<1x512xf32> to vector<8x512xf32>
    %6 = arith.addf %3, %5 : vector<8x512xf32>
    %cst_5 = arith.constant 0.000000e+00 : f32
    %7 = vector.broadcast %cst_5 : f32 to vector<8x512xf32>
    %8 = arith.maximumf %6, %7 : vector<8x512xf32>
    %9 = arith.truncf %8 : vector<8x512xf32> to vector<8x512xbf16>
    %c0_6 = arith.constant 0 : index
    %c0_7 = arith.constant 0 : index
    %10 = vector.load %arg4[%c0_6, %c0_7] : memref<512x256xbf16, #tpu.memory_space<vmem>>, vector<512x256xbf16>
    %cst_8 = arith.constant dense<0.000000e+00> : vector<8x256xf32>
    %11 = tpu.matmul %9, %10, %cst_8 {dimension_numbers = #tpu.dot_dimension_numbers<[1], [0], [0], [1], [0, 0, 1, 1], [], []>} : vector<8x512xbf16>, vector<512x256xbf16>, vector<8x256xf32> -> vector<8x256xf32>
    %c0_9 = arith.constant 0 : index
    %c0_10 = arith.constant 0 : index
    %12 = vector.load %arg5[%c0_9, %c0_10] : memref<1x256xf32, #tpu.memory_space<vmem>>, vector<1x256xf32>
    %13 = vector.broadcast %12 : vector<1x256xf32> to vector<8x256xf32>
    %14 = arith.addf %11, %13 : vector<8x256xf32>
    %cst_11 = arith.constant 0.000000e+00 : f32
    %15 = vector.broadcast %cst_11 : f32 to vector<8x256xf32>
    %16 = arith.maximumf %14, %15 : vector<8x256xf32>
    %17 = arith.truncf %16 : vector<8x256xf32> to vector<8x256xbf16>
    %c0_12 = arith.constant 0 : index
    %c0_13 = arith.constant 0 : index
    %18 = vector.load %arg6[%c0_12, %c0_13] : memref<256x128xbf16, #tpu.memory_space<vmem>>, vector<256x128xbf16>
    %cst_14 = arith.constant dense<0.000000e+00> : vector<8x128xf32>
    %19 = tpu.matmul %17, %18, %cst_14 {dimension_numbers = #tpu.dot_dimension_numbers<[1], [0], [0], [1], [0, 0, 1, 1], [], []>} : vector<8x256xbf16>, vector<256x128xbf16>, vector<8x128xf32> -> vector<8x128xf32>
    %c0_15 = arith.constant 0 : index
    %c0_16 = arith.constant 0 : index
    %20 = vector.load %arg7[%c0_15, %c0_16] : memref<1x128xf32, #tpu.memory_space<vmem>>, vector<1x128xf32>
    %21 = vector.broadcast %20 : vector<1x128xf32> to vector<8x128xf32>
    %22 = arith.addf %19, %21 : vector<8x128xf32>
    %cst_17 = arith.constant 0.000000e+00 : f32
    %23 = vector.broadcast %cst_17 : f32 to vector<8x128xf32>
    %24 = arith.maximumf %22, %23 : vector<8x128xf32>
    %25 = arith.truncf %24 : vector<8x128xf32> to vector<8x128xbf16>
    %c0_18 = arith.constant 0 : index
    %c0_19 = arith.constant 0 : index
    %26 = vector.load %arg8[%c0_18, %c0_19] : memref<128x128xbf16, #tpu.memory_space<vmem>>, vector<128x128xbf16>
    %cst_20 = arith.constant dense<0.000000e+00> : vector<8x128xf32>
    %27 = tpu.matmul %25, %26, %cst_20 {dimension_numbers = #tpu.dot_dimension_numbers<[1], [0], [0], [1], [0, 0, 1, 1], [], []>} : vector<8x128xbf16>, vector<128x128xbf16>, vector<8x128xf32> -> vector<8x128xf32>
    %c0_21 = arith.constant 0 : index
    %c0_22 = arith.constant 0 : index
    %28 = vector.load %arg9[%c0_21, %c0_22] : memref<1x128xf32, #tpu.memory_space<vmem>>, vector<1x128xf32>
    %29 = vector.broadcast %28 : vector<1x128xf32> to vector<8x128xf32>
    %30 = arith.addf %27, %29 : vector<8x128xf32>
    %31 = arith.truncf %30 : vector<8x128xf32> to vector<8x128xbf16>
    %c0_23 = arith.constant 0 : index
    %c0_24 = arith.constant 0 : index
    %32 = vector.load %arg10[%c0_23, %c0_24] : memref<8x128xbf16, #tpu.memory_space<vmem>>, vector<8x128xbf16>
    tpu.vector_store %arg10[%c0_23, %c0_24], %31 {strides = array<i32>} : memref<8x128xbf16, #tpu.memory_space<vmem>>, vector<8x128xbf16>,
    return
  }
  func.func @transform_0(%arg0: i32) -> (i32, i32) {
    %c0_i32 = arith.constant 0 : i32
    %c0_i32_0 = arith.constant 0 : i32
    return %arg0, %c0_i32 : i32, i32
  }
  func.func @transform_1(%arg0: i32) -> (i32, i32) {
    %c0_i32 = arith.constant 0 : i32
    %c0_i32_0 = arith.constant 0 : i32
    %c0_i32_1 = arith.constant 0 : i32
    return %c0_i32, %c0_i32_0 : i32, i32
  }
  func.func @transform_2(%arg0: i32) -> (i32, i32) {
    %c0_i32 = arith.constant 0 : i32
    %c0_i32_0 = arith.constant 0 : i32
    %c0_i32_1 = arith.constant 0 : i32
    return %c0_i32, %c0_i32_0 : i32, i32
  }
  func.func @transform_3(%arg0: i32) -> (i32, i32) {
    %c0_i32 = arith.constant 0 : i32
    %c0_i32_0 = arith.constant 0 : i32
    %c0_i32_1 = arith.constant 0 : i32
    return %c0_i32, %c0_i32_0 : i32, i32
  }
  func.func @transform_4(%arg0: i32) -> (i32, i32) {
    %c0_i32 = arith.constant 0 : i32
    %c0_i32_0 = arith.constant 0 : i32
    %c0_i32_1 = arith.constant 0 : i32
    return %c0_i32, %c0_i32_0 : i32, i32
  }
  func.func @transform_5(%arg0: i32) -> (i32, i32) {
    %c0_i32 = arith.constant 0 : i32
    %c0_i32_0 = arith.constant 0 : i32
    %c0_i32_1 = arith.constant 0 : i32
    return %c0_i32, %c0_i32_0 : i32, i32
  }
  func.func @transform_6(%arg0: i32) -> (i32, i32) {
    %c0_i32 = arith.constant 0 : i32
    %c0_i32_0 = arith.constant 0 : i32
    %c0_i32_1 = arith.constant 0 : i32
    return %c0_i32, %c0_i32_0 : i32, i32
  }
  func.func @transform_7(%arg0: i32) -> (i32, i32) {
    %c0_i32 = arith.constant 0 : i32
    %c0_i32_0 = arith.constant 0 : i32
    %c0_i32_1 = arith.constant 0 : i32
    return %c0_i32, %c0_i32_0 : i32, i32
  }
  func.func @transform_8(%arg0: i32) -> (i32, i32) {
    %c0_i32 = arith.constant 0 : i32
    %c0_i32_0 = arith.constant 0 : i32
    %c0_i32_1 = arith.constant 0 : i32
    return %c0_i32, %c0_i32_0 : i32, i32
  }
  func.func @transform_9(%arg0: i32) -> (i32, i32) {
    %c0_i32 = arith.constant 0 : i32
    %c0_i32_0 = arith.constant 0 : i32
    return %arg0, %c0_i32 : i32, i32
  }
}

</mosaic_0001>

<bundles_post_ra>
// kernel: mlp_mnist_forward.1
= control target key start
LH: loop header
LB: loop body
LE: loop exit
PB: predicated region body
PF: predicated region fallthrough
CT: control target
= control target key end

     0   :  { %14 = vsyncpa [#allocation3], 0  ;;  %s3191_s30 = smov [#allocation2]   ;;  %s3593_s0 = inlined_call_operand.vmem [shape: f32[8,784], index: 0, kind: input, shape index: {}]   ;;  %s3594_s1 = inlined_call_operand.hbm [shape: bf16[784,512], index: 1, kind: input, shape index: {}]   ;;  %s3595_s2 = inlined_call_operand.vmem [shape: f32[1,512], index: 2, kind: input, shape index: {}]   ;;  %s3596_s3 = inlined_call_operand.vmem [shape: bf16[512,256], index: 3, kind: input, shape index: {}]   ;;  %s3597_s4 = inlined_call_operand.vmem [shape: f32[1,256], index: 4, kind: input, shape index: {}]   ;;  %s3598_s5 = inlined_call_operand.vmem [shape: bf16[256,128], index: 5, kind: input, shape index: {}]   ;;  %s3599_s6 = inlined_call_operand.vmem [shape: f32[1,128], index: 6, kind: input, shape index: {}]   ;;  %s3600_s7 = inlined_call_operand.vmem [shape: bf16[128,128], index: 7, kind: input, shape index: {}]   ;;  %s3601_s8 = inlined_call_operand.vmem [shape: f32[1,128], index: 8, kind: input, shape index: {}]   ;;  %s3602_s9 = inlined_call_operand.vmem [shape: bf16[8,128], index: 9, kind: output, shape index: {}]  }
   0x1   :  { %s22_s10 = sshll.u32 %s3191_s30, 4  ;;  %s3167_s13 = scalar_lea.hbm %s3594_s1, 25088  ;;  %s23_s10 = int_to_ptr.vmem [resolvable:$true] %s22_s10 }
   0x2   :  { %p3168_p0 = scmp.ne.s32.totalorder %s3594_s1, %s3167_s13  ;;  %p3171_p1 = scmp.lt.u32.totalorder %s3167_s13, %s3594_s1 }
   0x4   :  { %p3173_p2 = pnand %p3171_p1, %p3168_p0 }
   0x6   :  { %3176 = shalt.err (!%p3173_p2)
}
   0x7   :  { %s3177_s18 = scalar_lea.vmem %s23_s10, 25088  ;;  %p3182_p4 = scmp.lt.s32.totalorder %s23_s10, %s23_s10 }
   0x8   :  { %p3178_p3 = scmp.ne.s32.totalorder %s23_s10, %s3177_s18  ;;  %p3183_p5 = scmp.lt.s32.totalorder %s3177_s18, %s3177_s18 }
   0xa   :  { %p3184_p6 = por %p3183_p5, %p3182_p4 }
   0xc   :  { %p3185_p7 = pnand %p3184_p6, %p3178_p3 }
   0xe   :  { %3188 = shalt.err (!%p3185_p7)
}
   0xf   :  { %s3192_s19 = smov 256   ;;  %s3193_s20 = smov 16  }
  0x10   :  { %28 = dma.hbm_to_vmem [thread:$0]  %s3594_s1, 25088, %s23_s10, [#allocation3], %s3192_s19, %s3192_s19, %s3193_s20  }
  0x11   :  { %3189 = dma.done.wait [#allocation3], 25088  }
  0x12   :  { %3190 = vsyncadd [#allocation3], 4294942208  ;;  %v3194_v0 = vmov 0   ;;  %v2753_v1 = vld [vmem:[#allocation2 + $0x4] ss:$16 sps:$4 sm:$0xff]   ;;  %vm1259_vm0 = vcmask 130048  }
  0x13   :  { %1418 = vmatprep.mubr.bf16.mxu1 %v3194_v0  ;;  %v2755_v2 = vld [vmem:[#allocation2 + $0x604] ss:$16 sps:$4 sm:$0xff]   ;;  %1263 = vmatprep.subr.bf16.mxu0 %v2753_v1  ;;  %v2757_v3 = vld [vmem:[#allocation2] ss:$16 sps:$4 sm:$0xff]   ;;  %v2761_v6 = vld [vmem:[#allocation2 + $0x8] ss:$16 sps:$4 sm:$0xff]  }
  0x14   :  { %v2758_v4 = vld [vmem:[#allocation2 + $0x600] ss:$16 sps:$4 sm:$0xff]   ;;  %1386 = vmatprep.subr.bf16.mxu1 %v2755_v2  ;;  %v2759_v5 = vld [vmem:[#allocation2 + $0x24] ss:$16 sps:$4 sm:$0xff]   ;;  %1264 = vmatpush1.bf16.msra.mxu0 %v2757_v3  ;;  %v2763_v7 = vld [vmem:[#allocation2 + $0xc] ss:$16 sps:$4 sm:$0xff]  }
  0x15   :  { %1387 = vmatpush1.bf16.msra.mxu1 %v2758_v4  ;;  %1265 = vmatprep.subr.bf16.mxu0 %v2759_v5  ;;  %v2764_v8 = vld [vmem:[#allocation2 + $0x20] ss:$16 sps:$4 sm:$0xff]   ;;  %v2765_v11 = vld [vmem:[#allocation2 + $0x44] ss:$16 sps:$4 sm:$0xff]   ;;  %v2767_v12 = vld [vmem:[#allocation2 + $0x28] ss:$16 sps:$4 sm:$0xff]  }
  0x16   :  { %v53_v9 = vld [vmem:[%s3593_s0 + $0x30] sm:$0xff]  ;;  %1427 = vmatprep.subr.bf16.mxu1 %v2763_v7  ;;  %v2769_v13 = vld [vmem:[#allocation2 + $0x2c] ss:$16 sps:$4 sm:$0xff]   ;;  %v2773_v18 = vld [vmem:[#allocation2 + $0x48] ss:$16 sps:$4 sm:$0xff]   ;;  %vm3196_vm1 = vmmov 0  }
  0x17   :  { %v3263_v10 = vpack.c.bf16 %v53_v9, %v53_v9  ;;  %v2770_v14 = vld [vmem:[#allocation2 + $0x40] ss:$16 sps:$4 sm:$0xff]   ;;  %v2771_v15 = vld [vmem:[#allocation2 + $0x64] ss:$16 sps:$4 sm:$0xff]   ;;  %v2775_v16 = vld [vmem:[#allocation2 + $0x4c] ss:$16 sps:$4 sm:$0xff]  }
  0x18   :  { %1266 = vmatpush1.bf16.msra.mxu0 %v2764_v8  ;;  %v2776_v17 = vld [vmem:[#allocation2 + $0x60] ss:$16 sps:$4 sm:$0xff]   ;;  %v2777_v19 = vld [vmem:[#allocation2 + $0x84] ss:$16 sps:$4 sm:$0xff]   ;;  %v2781_v20 = vld [vmem:[#allocation2 + $0x6c] ss:$16 sps:$4 sm:$0xff]  }
  0x19   :  { %2572 = vmatmul.mubr.msk.bf16.vlgmr.msra.gmra.mrb[0].mxu1 %vm1259_vm0, %v3263_v10  ;;  %1267 = vmatprep.subr.bf16.mxu0 %v2765_v11  ;;  %v2779_v21 = vld [vmem:[#allocation2 + $0x68] ss:$16 sps:$4 sm:$0xff]   ;;  %v2782_v22 = vld [vmem:[#allocation2 + $0x80] ss:$16 sps:$4 sm:$0xff]   ;;  %v2783_v23 = vld [vmem:[#allocation2 + $0xa4] ss:$16 sps:$4 sm:$0xff]  }
  0x1a   :  { %1428 = vmatpush1.bf16.msra.mxu1 %v2761_v6  ;;  %v2787_v24 = vld [vmem:[#allocation2 + $0x8c] ss:$16 sps:$4 sm:$0xff]   ;;  %v2788_v25 = vld [vmem:[#allocation2 + $0xa0] ss:$16 sps:$4 sm:$0xff]   ;;  %v2785_v26 = vld [vmem:[#allocation2 + $0x88] ss:$16 sps:$4 sm:$0xff]  }
  0x1b   :  { %1429 = vmatprep.subr.bf16.mxu1 %v2769_v13  ;;  %v2789_v27 = vld [vmem:[#allocation2 + $0xc4] ss:$16 sps:$4 sm:$0xff]   ;;  %v2793_v28 = vld [vmem:[#allocation2 + $0xac] ss:$16 sps:$4 sm:$0xff]   ;;  %v2791_v29 = vld [vmem:[#allocation2 + $0xa8] ss:$16 sps:$4 sm:$0xff]  }
  0x1c   :  { %1268 = vmatpush1.bf16.msra.mxu0 %v2770_v14  ;;  %v2794_v30 = vld [vmem:[#allocation2 + $0xc0] ss:$16 sps:$4 sm:$0xff]   ;;  %v2795_v31 = vld [vmem:[#allocation2 + $0xe4] ss:$16 sps:$4 sm:$0xff]   ;;  %v2799_v32 = vld [vmem:[#allocation2 + $0xcc] ss:$16 sps:$4 sm:$0xff]  }
  0x1d   :  { %1269 = vmatprep.subr.bf16.mxu0 %v2771_v15  ;;  %v2800_v33 = vld [vmem:[#allocation2 + $0xe0] ss:$16 sps:$4 sm:$0xff]   ;;  %v2797_v34 = vld [vmem:[#allocation2 + $0xc8] ss:$16 sps:$4 sm:$0xff]   ;;  %v2801_v35 = vld [vmem:[#allocation2 + $0x104] ss:$16 sps:$4 sm:$0xff]  }
  0x1e   :  { %1430 = vmatpush1.bf16.msra.mxu1 %v2767_v12  ;;  %v2805_v36 = vld [vmem:[#allocation2 + $0xec] ss:$16 sps:$4 sm:$0xff]   ;;  %v2803_v37 = vld [vmem:[#allocation2 + $0xe8] ss:$16 sps:$4 sm:$0xff]   ;;  %v2806_v38 = vld [vmem:[#allocation2 + $0x100] ss:$16 sps:$4 sm:$0xff]  }
  0x1f   :  { %1431 = vmatprep.subr.bf16.mxu1 %v2775_v16  ;;  %v2807_v39 = vld [vmem:[#allocation2 + $0x124] ss:$16 sps:$4 sm:$0xff]   ;;  %v2811_v40 = vld [vmem:[#allocation2 + $0x10c] ss:$16 sps:$4 sm:$0xff]   ;;  %v2812_v41 = vld [vmem:[#allocation2 + $0x120] ss:$16 sps:$4 sm:$0xff]  }
  0x20   :  { %1270 = vmatpush1.bf16.msra.mxu0 %v2776_v17  ;;  %v2809_v42 = vld [vmem:[#allocation2 + $0x108] ss:$16 sps:$4 sm:$0xff]   ;;  %v2813_v43 = vld [vmem:[#allocation2 + $0x144] ss:$16 sps:$4 sm:$0xff]   ;;  %v2817_v44 = vld [vmem:[#allocation2 + $0x12c] ss:$16 sps:$4 sm:$0xff]  }
  0x21   :  { %1271 = vmatprep.subr.bf16.mxu0 %v2777_v19  ;;  %v2815_v45 = vld [vmem:[#allocation2 + $0x128] ss:$16 sps:$4 sm:$0xff]   ;;  %v2818_v46 = vld [vmem:[#allocation2 + $0x140] ss:$16 sps:$4 sm:$0xff]   ;;  %v2819_v47 = vld [vmem:[#allocation2 + $0x164] ss:$16 sps:$4 sm:$0xff]  }
  0x22   :  { %1432 = vmatpush1.bf16.msra.mxu1 %v2773_v18  ;;  %v2823_v48 = vld [vmem:[#allocation2 + $0x14c] ss:$16 sps:$4 sm:$0xff]   ;;  %v2824_v50 = vld [vmem:[#allocation2 + $0x160] ss:$16 sps:$4 sm:$0xff]   ;;  %v2821_v52 = vld [vmem:[#allocation2 + $0x148] ss:$16 sps:$4 sm:$0xff]  }
  0x23   :  { %1433 = vmatprep.subr.bf16.mxu1 %v2781_v20  ;;  %v48_v49 = vld [vmem:[%s3593_s0 + $0x8] sm:$0xff]  ;;  %v2825_v53 = vld [vmem:[#allocation2 + $0x184] ss:$16 sps:$4 sm:$0xff]   ;;  %v2830_v56 = vld [vmem:[#allocation2 + $0x180] ss:$16 sps:$4 sm:$0xff]  }
  0x24   :  { %1272 = vmatpush1.bf16.msra.mxu0 %v2782_v22  ;;  %v55_v51 = vpack.c.bf16 %v48_v49, %v48_v49  ;;  %v2829_v54 = vld [vmem:[#allocation2 + $0x16c] ss:$16 sps:$4 sm:$0xff]   ;;  %v2827_v55 = vld [vmem:[#allocation2 + $0x168] ss:$16 sps:$4 sm:$0xff]   ;;  %v2831_v57 = vld [vmem:[#allocation2 + $0x1a4] ss:$16 sps:$4 sm:$0xff]  }
  0x25   :  { %1273 = vmatprep.subr.bf16.mxu0 %v2783_v23  ;;  %v2835_v58 = vld [vmem:[#allocation2 + $0x18c] ss:$16 sps:$4 sm:$0xff]   ;;  %v2833_v59 = vld [vmem:[#allocation2 + $0x188] ss:$16 sps:$4 sm:$0xff]   ;;  %v2836_v60 = vld [vmem:[#allocation2 + $0x1a0] ss:$16 sps:$4 sm:$0xff]  }
  0x26   :  { %1434 = vmatpush1.bf16.msra.mxu1 %v2779_v21  ;;  %1295 = vmatprep.mubr.bf16.mxu0 %v55_v51  ;;  %v2837_v61 = vld [vmem:[#allocation2 + $0x1c4] ss:$16 sps:$4 sm:$0xff]   ;;  %v2841_v62 = vld [vmem:[#allocation2 + $0x1ac] ss:$16 sps:$4 sm:$0xff]   ;;  %v2839_v63 = vld [vmem:[#allocation2 + $0x1a8] ss:$16 sps:$4 sm:$0xff]  }
  0x27   :  { %1435 = vmatprep.subr.bf16.mxu1 %v2787_v24  ;;  %1459 = vmatprep.mubr.bf16.mxu1 %v55_v51  ;;  %v2842_v1 = vld [vmem:[#allocation2 + $0x1c0] ss:$16 sps:$4 sm:$0xff]   ;;  %v2843_v2 = vld [vmem:[#allocation2 + $0x1e4] ss:$16 sps:$4 sm:$0xff]   ;;  %v2847_v3 = vld [vmem:[#allocation2 + $0x1cc] ss:$16 sps:$4 sm:$0xff]  }
  0x28   :  { %1274 = vmatpush1.bf16.msra.mxu0 %v2788_v25  ;;  %v2845_v4 = vld [vmem:[#allocation2 + $0x1c8] ss:$16 sps:$4 sm:$0xff]   ;;  %v2848_v5 = vld [vmem:[#allocation2 + $0x1e0] ss:$16 sps:$4 sm:$0xff]   ;;  %v2851_v7 = vld [vmem:[#allocation2 + $0x204] ss:$16 sps:$4 sm:$0xff]  }
  0x29   :  { %1275 = vmatprep.subr.bf16.mxu0 %v2789_v27  ;;  %v47_v6 = vld [vmem:[%s3593_s0] sm:$0xff]  ;;  %v2854_v8 = vld [vmem:[#allocation2 + $0x1ec] ss:$16 sps:$4 sm:$0xff]   ;;  %v2852_v12 = vld [vmem:[#allocation2 + $0x1e8] ss:$16 sps:$4 sm:$0xff]  }
  0x2a   :  { %1436 = vmatpush1.bf16.msra.mxu1 %v2785_v26  ;;  %v54_v9 = vpack.c.bf16 %v47_v6, %v47_v6  ;;  %v2849_v11 = vld [vmem:[#allocation2 + $0x200] ss:$16 sps:$4 sm:$0xff]   ;;  %v2857_v13 = vld [vmem:[#allocation2 + $0x224] ss:$16 sps:$4 sm:$0xff]   ;;  %v2860_v14 = vld [vmem:[#allocation2 + $0x20c] ss:$16 sps:$4 sm:$0xff]  }
  0x2b   :  { %1437 = vmatprep.subr.bf16.mxu1 %v2793_v28  ;;  %v2855_v15 = vld [vmem:[#allocation2 + $0x220] ss:$16 sps:$4 sm:$0xff]   ;;  %v2858_v16 = vld [vmem:[#allocation2 + $0x208] ss:$16 sps:$4 sm:$0xff]   ;;  %v2863_v17 = vld [vmem:[#allocation2 + $0x244] ss:$16 sps:$4 sm:$0xff]  }
  0x2c   :  { %1276 = vmatpush1.bf16.msra.mxu0 %v2794_v30  ;;  %v2866_v18 = vld [vmem:[#allocation2 + $0x22c] ss:$16 sps:$4 sm:$0xff]   ;;  %v2861_v19 = vld [vmem:[#allocation2 + $0x240] ss:$16 sps:$4 sm:$0xff]   ;;  %v2864_v20 = vld [vmem:[#allocation2 + $0x228] ss:$16 sps:$4 sm:$0xff]  }
  0x2d   :  { %1277 = vmatprep.subr.bf16.mxu0 %v2795_v31  ;;  %v2869_v21 = vld [vmem:[#allocation2 + $0x264] ss:$16 sps:$4 sm:$0xff]   ;;  %v2872_v22 = vld [vmem:[#allocation2 + $0x24c] ss:$16 sps:$4 sm:$0xff]   ;;  %v2867_v23 = vld [vmem:[#allocation2 + $0x260] ss:$16 sps:$4 sm:$0xff]  }
  0x2e   :  { %1438 = vmatpush1.bf16.msra.mxu1 %v2791_v29  ;;  %v2870_v24 = vld [vmem:[#allocation2 + $0x248] ss:$16 sps:$4 sm:$0xff]   ;;  %v2875_v25 = vld [vmem:[#allocation2 + $0x284] ss:$16 sps:$4 sm:$0xff]   ;;  %v2878_v26 = vld [vmem:[#allocation2 + $0x26c] ss:$16 sps:$4 sm:$0xff]  }
  0x2f   :  { %1439 = vmatprep.subr.bf16.mxu1 %v2799_v32  ;;  %v2873_v27 = vld [vmem:[#allocation2 + $0x280] ss:$16 sps:$4 sm:$0xff]   ;;  %v2876_v28 = vld [vmem:[#allocation2 + $0x268] ss:$16 sps:$4 sm:$0xff]   ;;  %v2881_v29 = vld [vmem:[#allocation2 + $0x2a4] ss:$16 sps:$4 sm:$0xff]  }
  0x30   :  { %1278 = vmatpush1.bf16.msra.mxu0 %v2800_v33  ;;  %v2884_v30 = vld [vmem:[#allocation2 + $0x28c] ss:$16 sps:$4 sm:$0xff]   ;;  %v2879_v31 = vld [vmem:[#allocation2 + $0x2a0] ss:$16 sps:$4 sm:$0xff]   ;;  %v2882_v32 = vld [vmem:[#allocation2 + $0x288] ss:$16 sps:$4 sm:$0xff]  }
  0x31   :  { %1279 = vmatprep.subr.bf16.mxu0 %v2801_v35  ;;  %v2887_v33 = vld [vmem:[#allocation2 + $0x2c4] ss:$16 sps:$4 sm:$0xff]   ;;  %v50_v35 = vld [vmem:[%s3593_s0 + $0x18] sm:$0xff]  ;;  %v2903_v49 = vld [vmem:[#allocation2 + $0x320] ss:$16 sps:$4 sm:$0xff]  }
  0x32   :  { %1440 = vmatpush1.bf16.msra.mxu1 %v2797_v34  ;;  %v2890_v34 = vld [vmem:[#allocation2 + $0x2ac] ss:$16 sps:$4 sm:$0xff]   ;;  %v2911_v51 = vld [vmem:[#allocation2 + $0x344] ss:$16 sps:$4 sm:$0xff]   ;;  %v2933_v6 = vld [vmem:[#allocation2 + $0x3c0] ss:$16 sps:$4 sm:$0xff]  }
  0x33   :  { %1441 = vmatprep.subr.bf16.mxu1 %v2805_v36  ;;  %v57_v36 = vpack.c.bf16 %v50_v35, %v50_v35  ;;  %v2969_v35 = vld [vmem:[#allocation2 + $0x480] ss:$16 sps:$4 sm:$0xff]  }
  0x34   :  { %1280 = vmatpush1.bf16.msra.mxu0 %v2806_v38  ;;  %v2888_v38 = vld [vmem:[#allocation2 + $0x2a8] ss:$16 sps:$4 sm:$0xff]  }
  0x35   :  { %1281 = vmatprep.subr.bf16.mxu0 %v2807_v39  ;;  %v2893_v39 = vld [vmem:[#allocation2 + $0x2e4] ss:$16 sps:$4 sm:$0xff]  }
  0x36   :  { %1442 = vmatpush1.bf16.msra.mxu1 %v2803_v37  ;;  %v2885_v37 = vld [vmem:[#allocation2 + $0x2c0] ss:$16 sps:$4 sm:$0xff]  }
  0x37   :  { %1443 = vmatprep.subr.bf16.mxu1 %v2811_v40  ;;  %v2896_v40 = vld [vmem:[#allocation2 + $0x2cc] ss:$16 sps:$4 sm:$0xff]  }
  0x38   :  { %1282 = vmatpush1.bf16.msra.mxu0 %v2812_v41  ;;  %v2891_v41 = vld [vmem:[#allocation2 + $0x2e0] ss:$16 sps:$4 sm:$0xff]  }
  0x39   :  { %1283 = vmatprep.subr.bf16.mxu0 %v2813_v43  ;;  %v2899_v43 = vld [vmem:[#allocation2 + $0x304] ss:$16 sps:$4 sm:$0xff]  }
  0x3a   :  { %1444 = vmatpush1.bf16.msra.mxu1 %v2809_v42  ;;  %v2894_v42 = vld [vmem:[#allocation2 + $0x2c8] ss:$16 sps:$4 sm:$0xff]  }
  0x3b   :  { %1445 = vmatprep.subr.bf16.mxu1 %v2817_v44  ;;  %v2902_v44 = vld [vmem:[#allocation2 + $0x2ec] ss:$16 sps:$4 sm:$0xff]  }
  0x3c   :  { %1284 = vmatpush1.bf16.msra.mxu0 %v2818_v46  ;;  %v2900_v46 = vld [vmem:[#allocation2 + $0x2e8] ss:$16 sps:$4 sm:$0xff]  }
  0x3d   :  { %1285 = vmatprep.subr.bf16.mxu0 %v2819_v47  ;;  %v2905_v47 = vld [vmem:[#allocation2 + $0x324] ss:$16 sps:$4 sm:$0xff]  }
  0x3e   :  { %1446 = vmatpush1.bf16.msra.mxu1 %v2815_v45  ;;  %v2897_v45 = vld [vmem:[#allocation2 + $0x300] ss:$16 sps:$4 sm:$0xff]  }
  0x3f   :  { %1447 = vmatprep.subr.bf16.mxu1 %v2823_v48  ;;  %v2908_v48 = vld [vmem:[#allocation2 + $0x30c] ss:$16 sps:$4 sm:$0xff]  }
  0x40   :  { %1286 = vmatpush1.bf16.msra.mxu0 %v2824_v50  ;;  %v2906_v50 = vld [vmem:[#allocation2 + $0x308] ss:$16 sps:$4 sm:$0xff]  }
  0x41   :  { %1287 = vmatprep.subr.bf16.mxu0 %v2825_v53  ;;  %v2909_v53 = vld [vmem:[#allocation2 + $0x340] ss:$16 sps:$4 sm:$0xff]  }
  0x42   :  { %1448 = vmatpush1.bf16.msra.mxu1 %v2821_v52  ;;  %v2914_v52 = vld [vmem:[#allocation2 + $0x32c] ss:$16 sps:$4 sm:$0xff]  }
  0x43   :  { %1449 = vmatprep.subr.bf16.mxu1 %v2829_v54  ;;  %v2912_v54 = vld [vmem:[#allocation2 + $0x328] ss:$16 sps:$4 sm:$0xff]  }
  0x44   :  { %1288 = vmatpush1.bf16.msra.mxu0 %v2830_v56  ;;  %v2920_v56 = vld [vmem:[#allocation2 + $0x34c] ss:$16 sps:$4 sm:$0xff]  }
  0x45   :  { %1289 = vmatprep.subr.bf16.mxu0 %v2831_v57  ;;  %v2915_v57 = vld [vmem:[#allocation2 + $0x360] ss:$16 sps:$4 sm:$0xff]  }
  0x46   :  { %1450 = vmatpush1.bf16.msra.mxu1 %v2827_v55  ;;  %v2917_v55 = vld [vmem:[#allocation2 + $0x364] ss:$16 sps:$4 sm:$0xff]  }
  0x47   :  { %1451 = vmatprep.subr.bf16.mxu1 %v2835_v58  ;;  %v2918_v58 = vld [vmem:[#allocation2 + $0x348] ss:$16 sps:$4 sm:$0xff]  }
  0x48   :  { %1290 = vmatpush1.bf16.msra.mxu0 %v2836_v60  ;;  %v2926_v60 = vld [vmem:[#allocation2 + $0x36c] ss:$16 sps:$4 sm:$0xff]  }
  0x49   :  { %1291 = vmatprep.subr.bf16.mxu0 %v2837_v61  ;;  %v2921_v61 = vld [vmem:[#allocation2 + $0x380] ss:$16 sps:$4 sm:$0xff]  }
  0x4a   :  { %1452 = vmatpush1.bf16.msra.mxu1 %v2833_v59  ;;  %v2923_v59 = vld [vmem:[#allocation2 + $0x384] ss:$16 sps:$4 sm:$0xff]  }
  0x4b   :  { %1453 = vmatprep.subr.bf16.mxu1 %v2841_v62  ;;  %v2924_v62 = vld [vmem:[#allocation2 + $0x368] ss:$16 sps:$4 sm:$0xff]  }
  0x4c   :  { %1292 = vmatpush1.bf16.msra.mxu0 %v2842_v1  ;;  %v2932_v1 = vld [vmem:[#allocation2 + $0x38c] ss:$16 sps:$4 sm:$0xff]  }
  0x4d   :  { %1293 = vmatprep.subr.bf16.mxu0 %v2843_v2  ;;  %v2927_v2 = vld [vmem:[#allocation2 + $0x3a0] ss:$16 sps:$4 sm:$0xff]  }
  0x4e   :  { %1454 = vmatpush1.bf16.msra.mxu1 %v2839_v63  ;;  %v2929_v63 = vld [vmem:[#allocation2 + $0x3a4] ss:$16 sps:$4 sm:$0xff]  }
  0x4f   :  { %1455 = vmatprep.subr.bf16.mxu1 %v2847_v3  ;;  %v2930_v3 = vld [vmem:[#allocation2 + $0x388] ss:$16 sps:$4 sm:$0xff]  }
  0x50   :  { %1294 = vmatpush1.bf16.msra.mxu0 %v2848_v5  ;;  %v2938_v5 = vld [vmem:[#allocation2 + $0x3ac] ss:$16 sps:$4 sm:$0xff]  }
  0x51   :  { %1304 = vmatprep.subr.bf16.mxu0 %v2851_v7  ;;  %v2936_v7 = vld [vmem:[#allocation2 + $0x3a8] ss:$16 sps:$4 sm:$0xff]  }
  0x52   :  { %1456 = vmatpush1.bf16.msra.mxu1 %v2845_v4  ;;  %v2935_v4 = vld [vmem:[#allocation2 + $0x3c4] ss:$16 sps:$4 sm:$0xff]  }
  0x53   :  { %1457 = vmatprep.subr.bf16.mxu1 %v2854_v8  ;;  %1296 = vmatmul.mubr.bf16.vlgmr.msra.gmra.mrb[0].mxu0 %v54_v9  ;;  %v2941_v8 = vld [vmem:[#allocation2 + $0x3e4] ss:$16 sps:$4 sm:$0xff]  }
  0x54   :  { %1305 = vmatpush1.bf16.msra.mxu0 %v2849_v11  ;;  %1336 = vmatprep.mubr.bf16.mxu0 %v57_v36  ;;  %v2939_v11 = vld [vmem:[#allocation2 + $0x3e0] ss:$16 sps:$4 sm:$0xff]  }
  0x55   :  { %1306 = vmatprep.subr.bf16.mxu0 %v2857_v13  ;;  %v2942_v13 = vld [vmem:[#allocation2 + $0x3c8] ss:$16 sps:$4 sm:$0xff]  }
  0x56   :  { %1458 = vmatpush1.bf16.msra.mxu1 %v2852_v12  ;;  %v49_v12 = vld [vmem:[%s3593_s0 + $0x10] sm:$0xff] }
  0x57   :  { %1468 = vmatprep.subr.bf16.mxu1 %v2860_v14  ;;  %v2947_v14 = vld [vmem:[#allocation2 + $0x404] ss:$16 sps:$4 sm:$0xff]  }
  0x58   :  { %1307 = vmatpush1.bf16.msra.mxu0 %v2855_v15  ;;  %v2950_v15 = vld [vmem:[#allocation2 + $0x3ec] ss:$16 sps:$4 sm:$0xff]  }
  0x59   :  { %1460 = vmatmul.mubr.bf16.vlgmr.msra.gmra.mrb[4].mxu1 %v54_v9  ;;  %1308 = vmatprep.subr.bf16.mxu0 %v2863_v17  ;;  %v2944_v9 = vld [vmem:[#allocation2 + $0x3cc] ss:$16 sps:$4 sm:$0xff]   ;;  %v2945_v17 = vld [vmem:[#allocation2 + $0x400] ss:$16 sps:$4 sm:$0xff]  }
  0x5a   :  { %1469 = vmatpush1.bf16.msra.mxu1 %v2858_v16  ;;  %1500 = vmatprep.mubr.bf16.mxu1 %v57_v36  ;;  %v56_v16 = vpack.c.bf16 %v49_v12, %v49_v12  ;;  %v2972_v36 = vld [vmem:[#allocation2 + $0x468] ss:$16 sps:$4 sm:$0xff]   ;;  %v3034_v12 = vld [vmem:[#allocation2 + $0x5ac] ss:$16 sps:$4 sm:$0xff]  }
  0x5b   :  { %1470 = vmatprep.subr.bf16.mxu1 %v2866_v18  ;;  %v2948_v18 = vld [vmem:[#allocation2 + $0x3e8] ss:$16 sps:$4 sm:$0xff]  }
  0x5c   :  { %1309 = vmatpush1.bf16.msra.mxu0 %v2861_v19  ;;  %v2953_v19 = vld [vmem:[#allocation2 + $0x424] ss:$16 sps:$4 sm:$0xff]  }
  0x5d   :  { %1310 = vmatprep.subr.bf16.mxu0 %v2869_v21  ;;  %v2956_v21 = vld [vmem:[#allocation2 + $0x40c] ss:$16 sps:$4 sm:$0xff]  }
  0x5e   :  { %1471 = vmatpush1.bf16.msra.mxu1 %v2864_v20  ;;  %v52_v20 = vld [vmem:[%s3593_s0 + $0x28] sm:$0xff] }
  0x5f   :  { %1472 = vmatprep.subr.bf16.mxu1 %v2872_v22  ;;  %v59_v22 = vpack.c.bf16 %v52_v20, %v52_v20  ;;  %v3049_v20 = vld [vmem:[%s3596_s3 + $0x4] ss:$8 sps:$4 sm:$0xff]  }
  0x60   :  { %1311 = vmatpush1.bf16.msra.mxu0 %v2867_v23  ;;  %v2951_v23 = vld [vmem:[#allocation2 + $0x420] ss:$16 sps:$4 sm:$0xff]  }
  0x61   :  { %1312 = vmatprep.subr.bf16.mxu0 %v2875_v25  ;;  %v2959_v25 = vld [vmem:[#allocation2 + $0x444] ss:$16 sps:$4 sm:$0xff]  }
  0x62   :  { %1473 = vmatpush1.bf16.msra.mxu1 %v2870_v24  ;;  %v2954_v24 = vld [vmem:[#allocation2 + $0x408] ss:$16 sps:$4 sm:$0xff]  }
  0x63   :  { %1474 = vmatprep.subr.bf16.mxu1 %v2878_v26  ;;  %v2962_v26 = vld [vmem:[#allocation2 + $0x42c] ss:$16 sps:$4 sm:$0xff]  }
  0x64   :  { %1313 = vmatpush1.bf16.msra.mxu0 %v2873_v27  ;;  %v2957_v27 = vld [vmem:[#allocation2 + $0x440] ss:$16 sps:$4 sm:$0xff]  }
  0x65   :  { %1314 = vmatprep.subr.bf16.mxu0 %v2881_v29  ;;  %v2965_v29 = vld [vmem:[#allocation2 + $0x464] ss:$16 sps:$4 sm:$0xff]  }
  0x66   :  { %1475 = vmatpush1.bf16.msra.mxu1 %v2876_v28  ;;  %v2960_v28 = vld [vmem:[#allocation2 + $0x428] ss:$16 sps:$4 sm:$0xff]  }
  0x67   :  { %1476 = vmatprep.subr.bf16.mxu1 %v2884_v30  ;;  %v2968_v30 = vld [vmem:[#allocation2 + $0x44c] ss:$16 sps:$4 sm:$0xff]  }
  0x68   :  { %1315 = vmatpush1.bf16.msra.mxu0 %v2879_v31  ;;  %v2963_v31 = vld [vmem:[#allocation2 + $0x460] ss:$16 sps:$4 sm:$0xff]  }
  0x69   :  { %1316 = vmatprep.subr.bf16.mxu0 %v2887_v33  ;;  %v2971_v33 = vld [vmem:[#allocation2 + $0x484] ss:$16 sps:$4 sm:$0xff]  }
  0x6a   :  { %1477 = vmatpush1.bf16.msra.mxu1 %v2882_v32  ;;  %v2966_v32 = vld [vmem:[#allocation2 + $0x448] ss:$16 sps:$4 sm:$0xff]  }
  0x6b   :  { %1478 = vmatprep.subr.bf16.mxu1 %v2890_v34  ;;  %v2974_v34 = vld [vmem:[#allocation2 + $0x46c] ss:$16 sps:$4 sm:$0xff]  }
  0x6c   :  { %1317 = vmatpush1.bf16.msra.mxu0 %v2885_v37  ;;  %v2977_v37 = vld [vmem:[#allocation2 + $0x4a4] ss:$16 sps:$4 sm:$0xff]  }
  0x6d   :  { %1318 = vmatprep.subr.bf16.mxu0 %v2893_v39  ;;  %v2975_v39 = vld [vmem:[#allocation2 + $0x4a0] ss:$16 sps:$4 sm:$0xff]  }
  0x6e   :  { %1479 = vmatpush1.bf16.msra.mxu1 %v2888_v38  ;;  %v2980_v38 = vld [vmem:[#allocation2 + $0x48c] ss:$16 sps:$4 sm:$0xff]  }
  0x6f   :  { %1480 = vmatprep.subr.bf16.mxu1 %v2896_v40  ;;  %v2978_v40 = vld [vmem:[#allocation2 + $0x488] ss:$16 sps:$4 sm:$0xff]  }
  0x70   :  { %1319 = vmatpush1.bf16.msra.mxu0 %v2891_v41  ;;  %v2983_v41 = vld [vmem:[#allocation2 + $0x4c4] ss:$16 sps:$4 sm:$0xff]  }
  0x71   :  { %1320 = vmatprep.subr.bf16.mxu0 %v2899_v43  ;;  %v2981_v43 = vld [vmem:[#allocation2 + $0x4c0] ss:$16 sps:$4 sm:$0xff]  }
  0x72   :  { %1481 = vmatpush1.bf16.msra.mxu1 %v2894_v42  ;;  %v2986_v42 = vld [vmem:[#allocation2 + $0x4ac] ss:$16 sps:$4 sm:$0xff]  }
  0x73   :  { %1482 = vmatprep.subr.bf16.mxu1 %v2902_v44  ;;  %v2984_v44 = vld [vmem:[#allocation2 + $0x4a8] ss:$16 sps:$4 sm:$0xff]  }
  0x74   :  { %1321 = vmatpush1.bf16.msra.mxu0 %v2897_v45  ;;  %v2989_v45 = vld [vmem:[#allocation2 + $0x4e4] ss:$16 sps:$4 sm:$0xff]  }
  0x75   :  { %1322 = vmatprep.subr.bf16.mxu0 %v2905_v47  ;;  %v2987_v47 = vld [vmem:[#allocation2 + $0x4e0] ss:$16 sps:$4 sm:$0xff]  }
  0x76   :  { %1483 = vmatpush1.bf16.msra.mxu1 %v2900_v46  ;;  %v2992_v46 = vld [vmem:[#allocation2 + $0x4cc] ss:$16 sps:$4 sm:$0xff]  }
  0x77   :  { %1484 = vmatprep.subr.bf16.mxu1 %v2908_v48  ;;  %v2990_v48 = vld [vmem:[#allocation2 + $0x4c8] ss:$16 sps:$4 sm:$0xff]  }
  0x78   :  { %1323 = vmatpush1.bf16.msra.mxu0 %v2903_v49  ;;  %v2995_v49 = vld [vmem:[#allocation2 + $0x504] ss:$16 sps:$4 sm:$0xff]  }
  0x79   :  { %1324 = vmatprep.subr.bf16.mxu0 %v2911_v51  ;;  %v2993_v51 = vld [vmem:[#allocation2 + $0x500] ss:$16 sps:$4 sm:$0xff]  }
  0x7a   :  { %1485 = vmatpush1.bf16.msra.mxu1 %v2906_v50  ;;  %v2998_v50 = vld [vmem:[#allocation2 + $0x4ec] ss:$16 sps:$4 sm:$0xff]  }
  0x7b   :  { %1486 = vmatprep.subr.bf16.mxu1 %v2914_v52  ;;  %v2996_v52 = vld [vmem:[#allocation2 + $0x4e8] ss:$16 sps:$4 sm:$0xff]  }
  0x7c   :  { %1325 = vmatpush1.bf16.msra.mxu0 %v2909_v53  ;;  %v3001_v53 = vld [vmem:[#allocation2 + $0x524] ss:$16 sps:$4 sm:$0xff]  }
  0x7d   :  { %1326 = vmatprep.subr.bf16.mxu0 %v2917_v55  ;;  %v2999_v55 = vld [vmem:[#allocation2 + $0x520] ss:$16 sps:$4 sm:$0xff]  }
  0x7e   :  { %1487 = vmatpush1.bf16.msra.mxu1 %v2912_v54  ;;  %v3004_v54 = vld [vmem:[#allocation2 + $0x50c] ss:$16 sps:$4 sm:$0xff]  }
  0x7f   :  { %1488 = vmatprep.subr.bf16.mxu1 %v2920_v56  ;;  %v3002_v56 = vld [vmem:[#allocation2 + $0x508] ss:$16 sps:$4 sm:$0xff]  }
  0x80   :  { %1327 = vmatpush1.bf16.msra.mxu0 %v2915_v57  ;;  %v3007_v57 = vld [vmem:[#allocation2 + $0x544] ss:$16 sps:$4 sm:$0xff]  }
  0x81   :  { %1328 = vmatprep.subr.bf16.mxu0 %v2923_v59  ;;  %v3005_v59 = vld [vmem:[#allocation2 + $0x540] ss:$16 sps:$4 sm:$0xff]  }
  0x82   :  { %1489 = vmatpush1.bf16.msra.mxu1 %v2918_v58  ;;  %v3010_v58 = vld [vmem:[#allocation2 + $0x52c] ss:$16 sps:$4 sm:$0xff]  }
  0x83   :  { %1490 = vmatprep.subr.bf16.mxu1 %v2926_v60  ;;  %v3008_v60 = vld [vmem:[#allocation2 + $0x528] ss:$16 sps:$4 sm:$0xff]  }
  0x84   :  { %1329 = vmatpush1.bf16.msra.mxu0 %v2921_v61  ;;  %v3013_v61 = vld [vmem:[#allocation2 + $0x564] ss:$16 sps:$4 sm:$0xff]  }
  0x85   :  { %1330 = vmatprep.subr.bf16.mxu0 %v2929_v63  ;;  %v3011_v63 = vld [vmem:[#allocation2 + $0x560] ss:$16 sps:$4 sm:$0xff]  }
  0x86   :  { %1491 = vmatpush1.bf16.msra.mxu1 %v2924_v62  ;;  %v3016_v62 = vld [vmem:[#allocation2 + $0x54c] ss:$16 sps:$4 sm:$0xff]  }
  0x87   :  { %1492 = vmatprep.subr.bf16.mxu1 %v2932_v1  ;;  %v3014_v1 = vld [vmem:[#allocation2 + $0x548] ss:$16 sps:$4 sm:$0xff]  }
  0x88   :  { %1331 = vmatpush1.bf16.msra.mxu0 %v2927_v2  ;;  %v3019_v2 = vld [vmem:[#allocation2 + $0x584] ss:$16 sps:$4 sm:$0xff]  }
  0x89   :  { %1332 = vmatprep.subr.bf16.mxu0 %v2935_v4  ;;  %v3017_v4 = vld [vmem:[#allocation2 + $0x580] ss:$16 sps:$4 sm:$0xff]  }
  0x8a   :  { %1493 = vmatpush1.bf16.msra.mxu1 %v2930_v3  ;;  %v3022_v3 = vld [vmem:[#allocation2 + $0x56c] ss:$16 sps:$4 sm:$0xff]  }
  0x8b   :  { %1494 = vmatprep.subr.bf16.mxu1 %v2938_v5  ;;  %v3020_v5 = vld [vmem:[#allocation2 + $0x568] ss:$16 sps:$4 sm:$0xff]  }
  0x8c   :  { %1333 = vmatpush1.bf16.msra.mxu0 %v2933_v6  ;;  %v3025_v6 = vld [vmem:[#allocation2 + $0x5a4] ss:$16 sps:$4 sm:$0xff]  }
  0x8d   :  { %1334 = vmatprep.subr.bf16.mxu0 %v2941_v8  ;;  %v3023_v8 = vld [vmem:[#allocation2 + $0x5a0] ss:$16 sps:$4 sm:$0xff]  }
  0x8e   :  { %1495 = vmatpush1.bf16.msra.mxu1 %v2936_v7  ;;  %v3028_v7 = vld [vmem:[#allocation2 + $0x58c] ss:$16 sps:$4 sm:$0xff]  }
  0x8f   :  { %1496 = vmatprep.subr.bf16.mxu1 %v2944_v9  ;;  %v3026_v9 = vld [vmem:[#allocation2 + $0x588] ss:$16 sps:$4 sm:$0xff]  }
  0x90   :  { %1335 = vmatpush1.bf16.msra.mxu0 %v2939_v11  ;;  %v3031_v11 = vld [vmem:[#allocation2 + $0x5c4] ss:$16 sps:$4 sm:$0xff]  }
  0x91   :  { %1345 = vmatprep.subr.bf16.mxu0 %v2947_v14  ;;  %v3032_v14 = vld [vmem:[#allocation2 + $0x5a8] ss:$16 sps:$4 sm:$0xff]  }
  0x92   :  { %1497 = vmatpush1.bf16.msra.mxu1 %v2942_v13  ;;  %v3029_v13 = vld [vmem:[#allocation2 + $0x5c0] ss:$16 sps:$4 sm:$0xff]  }
  0x93   :  { %1498 = vmatprep.subr.bf16.mxu1 %v2950_v15  ;;  %1337 = vmatmul.mubr.bf16.vlgmr.msra.gmra.mrb[0].mxu0 %v56_v16  ;;  %v3037_v15 = vld [vmem:[#allocation2 + $0x5e4] ss:$16 sps:$4 sm:$0xff]  }
  0x94   :  { %1346 = vmatpush1.bf16.msra.mxu0 %v2945_v17  ;;  %1377 = vmatprep.mubr.bf16.mxu0 %v59_v22  ;;  %v3035_v17 = vld [vmem:[#allocation2 + $0x5e0] ss:$16 sps:$4 sm:$0xff]  }
  0x95   :  { %1347 = vmatprep.subr.bf16.mxu0 %v2953_v19  ;;  %v3038_v19 = vld [vmem:[#allocation2 + $0x5c8] ss:$16 sps:$4 sm:$0xff]  }
  0x96   :  { %1499 = vmatpush1.bf16.msra.mxu1 %v2948_v18  ;;  %v51_v18 = vld [vmem:[%s3593_s0 + $0x20] sm:$0xff] }
  0x97   :  { %1509 = vmatprep.subr.bf16.mxu1 %v2956_v21  ;;  %v3043_v21 = vld [vmem:[#allocation2 + $0x5ec] ss:$16 sps:$4 sm:$0xff]  }
  0x98   :  { %1348 = vmatpush1.bf16.msra.mxu0 %v2951_v23  ;;  %v3047_v23 = vld [vmem:[%s3596_s3] ss:$8 sps:$4 sm:$0xff]  }
  0x99   :  { %1501 = vmatmul.mubr.bf16.vlgmr.msra.gmra.mrb[4].mxu1 %v56_v16  ;;  %1349 = vmatprep.subr.bf16.mxu0 %v2959_v25  ;;  %v3040_v16 = vld [vmem:[#allocation2 + $0x5cc] ss:$16 sps:$4 sm:$0xff]  }
  0x9a   :  { %1510 = vmatpush1.bf16.msra.mxu1 %v2954_v24  ;;  %1541 = vmatprep.mubr.bf16.mxu1 %v59_v22  ;;  %v58_v22 = vpack.c.bf16 %v51_v18, %v51_v18  ;;  %v3041_v24 = vld [vmem:[#allocation2 + $0x5e8] ss:$16 sps:$4 sm:$0xff]   ;;  %v3052_v25 = vld [vmem:[%s3596_s3 + $0x14] ss:$8 sps:$4 sm:$0xff]  }
  0x9b   :  { %1511 = vmatprep.subr.bf16.mxu1 %v2962_v26  ;;  %v3046_v26 = vld [vmem:[#allocation2 + $0x60c] ss:$16 sps:$4 sm:$0xff]  }
  0x9c   :  { %1350 = vmatpush1.bf16.msra.mxu0 %v2957_v27  ;;  %v3050_v27 = vld [vmem:[%s3596_s3 + $0x10] ss:$8 sps:$4 sm:$0xff]  }
  0x9d   :  { %1351 = vmatprep.subr.bf16.mxu0 %v2965_v29  ;;  %v3055_v29 = vld [vmem:[%s3596_s3 + $0x24] ss:$8 sps:$4 sm:$0xff]  }
  0x9e   :  { %1512 = vmatpush1.bf16.msra.mxu1 %v2960_v28  ;;  %v3044_v28 = vld [vmem:[#allocation2 + $0x608] ss:$16 sps:$4 sm:$0xff]  }
  0x9f   :  { %1513 = vmatprep.subr.bf16.mxu1 %v2968_v30  ;;  %v3053_v30 = vld [vmem:[%s3596_s3 + $0x20] ss:$8 sps:$4 sm:$0xff]  }
  0xa0   :  { %1352 = vmatpush1.bf16.msra.mxu0 %v2963_v31  ;;  %v3058_v31 = vld [vmem:[%s3596_s3 + $0x34] ss:$8 sps:$4 sm:$0xff]  }
  0xa1   :  { %1353 = vmatprep.subr.bf16.mxu0 %v2971_v33  ;;  %v3061_v33 = vld [vmem:[%s3596_s3 + $0x44] ss:$8 sps:$4 sm:$0xff]  }
  0xa2   :  { %1514 = vmatpush1.bf16.msra.mxu1 %v2966_v32  ;;  %v3056_v32 = vld [vmem:[%s3596_s3 + $0x30] ss:$8 sps:$4 sm:$0xff]  }
  0xa3   :  { %1515 = vmatprep.subr.bf16.mxu1 %v2974_v34  ;;  %v3064_v34 = vld [vmem:[%s3596_s3 + $0x54] ss:$8 sps:$4 sm:$0xff]  }
  0xa4   :  { %1354 = vmatpush1.bf16.msra.mxu0 %v2969_v35  ;;  %v3062_v35 = vld [vmem:[%s3596_s3 + $0x50] ss:$8 sps:$4 sm:$0xff]  }
  0xa5   :  { %1355 = vmatprep.subr.bf16.mxu0 %v2977_v37  ;;  %v3065_v37 = vld [vmem:[%s3596_s3 + $0x60] ss:$8 sps:$4 sm:$0xff]  }
  0xa6   :  { %1516 = vmatpush1.bf16.msra.mxu1 %v2972_v36  ;;  %v3067_v36 = vld [vmem:[%s3596_s3 + $0x64] ss:$8 sps:$4 sm:$0xff]  }
  0xa7   :  { %1517 = vmatprep.subr.bf16.mxu1 %v2980_v38 }
  0xa8   :  { %1356 = vmatpush1.bf16.msra.mxu0 %v2975_v39 }
  0xa9   :  { %1357 = vmatprep.subr.bf16.mxu0 %v2983_v41 }
  0xaa   :  { %1518 = vmatpush1.bf16.msra.mxu1 %v2978_v40  ;;  %v3068_v40 = vld [vmem:[%s3596_s3 + $0x70] ss:$8 sps:$4 sm:$0xff]  }
  0xab   :  { %1519 = vmatprep.subr.bf16.mxu1 %v2986_v42  ;;  %v3073_v42 = vld [vmem:[%s3596_s3 + $0x84] ss:$8 sps:$4 sm:$0xff]  }
  0xac   :  { %1358 = vmatpush1.bf16.msra.mxu0 %v2981_v43 }
  0xad   :  { %1359 = vmatprep.subr.bf16.mxu0 %v2989_v45  ;;  %v3076_v45 = vld [vmem:[%s3596_s3 + $0x94] ss:$8 sps:$4 sm:$0xff]  }
  0xae   :  { %1520 = vmatpush1.bf16.msra.mxu1 %v2984_v44  ;;  %v3071_v44 = vld [vmem:[%s3596_s3 + $0x80] ss:$8 sps:$4 sm:$0xff]  }
  0xaf   :  { %1521 = vmatprep.subr.bf16.mxu1 %v2992_v46  ;;  %v3074_v46 = vld [vmem:[%s3596_s3 + $0x90] ss:$8 sps:$4 sm:$0xff]  }
  0xb0   :  { %1360 = vmatpush1.bf16.msra.mxu0 %v2987_v47  ;;  %v3079_v47 = vld [vmem:[%s3596_s3 + $0xa4] ss:$8 sps:$4 sm:$0xff]  }
  0xb1   :  { %1361 = vmatprep.subr.bf16.mxu0 %v2995_v49  ;;  %v3082_v49 = vld [vmem:[%s3596_s3 + $0xb4] ss:$8 sps:$4 sm:$0xff]  }
  0xb2   :  { %1522 = vmatpush1.bf16.msra.mxu1 %v2990_v48  ;;  %v3077_v48 = vld [vmem:[%s3596_s3 + $0xa0] ss:$8 sps:$4 sm:$0xff]  }
  0xb3   :  { %1523 = vmatprep.subr.bf16.mxu1 %v2998_v50  ;;  %v3080_v50 = vld [vmem:[%s3596_s3 + $0xb0] ss:$8 sps:$4 sm:$0xff]  }
  0xb4   :  { %1362 = vmatpush1.bf16.msra.mxu0 %v2993_v51  ;;  %v3085_v51 = vld [vmem:[%s3596_s3 + $0xc4] ss:$8 sps:$4 sm:$0xff]  }
  0xb5   :  { %1363 = vmatprep.subr.bf16.mxu0 %v3001_v53  ;;  %v3088_v53 = vld [vmem:[%s3596_s3 + $0xd4] ss:$8 sps:$4 sm:$0xff]  }
  0xb6   :  { %1524 = vmatpush1.bf16.msra.mxu1 %v2996_v52  ;;  %v3083_v52 = vld [vmem:[%s3596_s3 + $0xc0] ss:$8 sps:$4 sm:$0xff]  }
  0xb7   :  { %1525 = vmatprep.subr.bf16.mxu1 %v3004_v54  ;;  %v3086_v54 = vld [vmem:[%s3596_s3 + $0xd0] ss:$8 sps:$4 sm:$0xff]  }
  0xb8   :  { %1364 = vmatpush1.bf16.msra.mxu0 %v2999_v55  ;;  %v3091_v55 = vld [vmem:[%s3596_s3 + $0xe4] ss:$8 sps:$4 sm:$0xff]  }
  0xb9   :  { %1365 = vmatprep.subr.bf16.mxu0 %v3007_v57  ;;  %v3094_v57 = vld [vmem:[%s3596_s3 + $0xf4] ss:$8 sps:$4 sm:$0xff]  }
  0xba   :  { %1526 = vmatpush1.bf16.msra.mxu1 %v3002_v56  ;;  %v3089_v56 = vld [vmem:[%s3596_s3 + $0xe0] ss:$8 sps:$4 sm:$0xff]  }
  0xbb   :  { %1527 = vmatprep.subr.bf16.mxu1 %v3010_v58  ;;  %v3092_v58 = vld [vmem:[%s3596_s3 + $0xf0] ss:$8 sps:$4 sm:$0xff]  }
  0xbc   :  { %1366 = vmatpush1.bf16.msra.mxu0 %v3005_v59  ;;  %v3097_v59 = vld [vmem:[%s3596_s3 + $0x104] ss:$8 sps:$4 sm:$0xff]  }
  0xbd   :  { %1367 = vmatprep.subr.bf16.mxu0 %v3013_v61  ;;  %v3144_v61 = vld [vmem:[%s3598_s5] sm:$0xff]  }
  0xbe   :  { %1528 = vmatpush1.bf16.msra.mxu1 %v3008_v60  ;;  %v3143_v60 = vld [vmem:[%s3598_s5 + $0x40] sm:$0xff]  }
  0xbf   :  { %1529 = vmatprep.subr.bf16.mxu1 %v3016_v62  ;;  %v3145_v62 = vld [vmem:[%s3598_s5 + $0x48] sm:$0xff]  }
  0xc0   :  { %1368 = vmatpush1.bf16.msra.mxu0 %v3011_v63  ;;  %v3146_v63 = vld [vmem:[%s3598_s5 + $0x8] sm:$0xff]  }
  0xc1   :  { %1369 = vmatprep.subr.bf16.mxu0 %v3019_v2  ;;  %v3148_v2 = vld [vmem:[%s3598_s5 + $0x10] sm:$0xff]  }
  0xc2   :  { %1530 = vmatpush1.bf16.msra.mxu1 %v3014_v1  ;;  %v3147_v1 = vld [vmem:[%s3598_s5 + $0x50] sm:$0xff]  }
  0xc3   :  { %1531 = vmatprep.subr.bf16.mxu1 %v3022_v3  ;;  %v3149_v3 = vld [vmem:[%s3598_s5 + $0x58] sm:$0xff]  }
  0xc4   :  { %1370 = vmatpush1.bf16.msra.mxu0 %v3017_v4  ;;  %v3150_v4 = vld [vmem:[%s3598_s5 + $0x18] sm:$0xff]  }
  0xc5   :  { %1371 = vmatprep.subr.bf16.mxu0 %v3025_v6  ;;  %v3152_v6 = vld [vmem:[%s3598_s5 + $0x20] sm:$0xff]  }
  0xc6   :  { %1532 = vmatpush1.bf16.msra.mxu1 %v3020_v5  ;;  %v3151_v5 = vld [vmem:[%s3598_s5 + $0x60] sm:$0xff]  }
  0xc7   :  { %1533 = vmatprep.subr.bf16.mxu1 %v3028_v7  ;;  %v3153_v7 = vld [vmem:[%s3598_s5 + $0x68] sm:$0xff]  }
  0xc8   :  { %1372 = vmatpush1.bf16.msra.mxu0 %v3023_v8  ;;  %v3154_v8 = vld [vmem:[%s3598_s5 + $0x28] sm:$0xff]  }
  0xc9   :  { %1373 = vmatprep.subr.bf16.mxu0 %v3031_v11 }
  0xca   :  { %1534 = vmatpush1.bf16.msra.mxu1 %v3026_v9  ;;  %v259_v9 = vlaneseq }
  0xcb   :  { %1535 = vmatprep.subr.bf16.mxu1 %v3034_v12 }
  0xcc   :  { %1374 = vmatpush1.bf16.msra.mxu0 %v3029_v13  ;;  %v3427_v11 = vshrl.u32 %v259_v9, 7  ;;  %v3433_v13 = vld [vmem:[%s3595_s2] sm:$0xf]  ;;  %v3155_v9 = vld [vmem:[%s3598_s5 + $0x70] sm:$0xff]  }
  0xcd   :  { %1375 = vmatprep.subr.bf16.mxu0 %v3037_v15 }
  0xce   :  { %1536 = vmatpush1.bf16.msra.mxu1 %v3032_v14  ;;  %v261_v12 = vsub.s32 0, %v3427_v11  ;;  %v265_v14 = vsub.s32 1, %v3427_v11 }
  0xcf   :  { %1537 = vmatprep.subr.bf16.mxu1 %v3040_v16 }
  0xd0   :  { %1376 = vmatpush1.bf16.msra.mxu0 %v3035_v17  ;;  %v262_v15 = vrot.slane %v3433_v13, %v261_v12  ;;  %v266_v16 = vrot.slane %v3433_v13, %v265_v14 }
  0xd1   :  { %1995 = vmatprep.subr.bf16.mxu0 %v3049_v20 }
  0xd2   :  { %1538 = vmatpush1.bf16.msra.mxu1 %v3038_v19 }
  0xd3   :  { %1539 = vmatprep.subr.bf16.mxu1 %v3043_v21  ;;  %1378 = vmatmul.mubr.bf16.vlgmr.msra.gmra.mrb[0].mxu0 %v58_v22 }
  0xd4   :  { %1996 = vmatpush1.bf16.msra.mxu0 %v3047_v23 }
  0xd5   :  { %1997 = vmatprep.subr.bf16.mxu0 %v3052_v25 }
  0xd6   :  { %1540 = vmatpush1.bf16.msra.mxu1 %v3041_v24 }
  0xd7   :  { %1550 = vmatprep.subr.bf16.mxu1 %v3046_v26 }
  0xd8   :  { %1998 = vmatpush1.bf16.msra.mxu0 %v3050_v27 }
  0xd9   :  { %1542 = vmatmul.mubr.bf16.vlgmr.msra.gmra.mrb[4].mxu1 %v58_v22  ;;  %1999 = vmatprep.subr.bf16.mxu0 %v3055_v29 }
  0xda   :  { %1551 = vmatpush1.bf16.msra.mxu1 %v3044_v28  ;;  %1582 = vmatprep.mubr.bf16.mxu1 %v3194_v0  ;;  %v3059_v0 = vld [vmem:[%s3596_s3 + $0x40] ss:$8 sps:$4 sm:$0xff]  }
  0xdb   :  { %2664 = vmatprep.subr.bf16.mxu1 %v3143_v60  ;;  %v3095_v28 = vld [vmem:[%s3596_s3 + $0x100] ss:$8 sps:$4 sm:$0xff]  }
  0xdc   :  { %2000 = vmatpush1.bf16.msra.mxu0 %v3053_v30  ;;  %v3100_v30 = vld [vmem:[%s3596_s3 + $0x114] ss:$8 sps:$4 sm:$0xff]   ;;  %v3131_v60 = vld [vmem:[%s3596_s3 + $0x1c0] ss:$8 sps:$4 sm:$0xff]  }
  0xdd   :  { %2001 = vmatprep.subr.bf16.mxu0 %v3058_v31  ;;  %v273_v31 = vsub.s32 3, %v3427_v11 }
  0xe0   :  { %2002 = vmatpush1.bf16.msra.mxu0 %v3056_v32  ;;  %v3098_v32 = vld [vmem:[%s3596_s3 + $0x110] ss:$8 sps:$4 sm:$0xff]  }
  0xe1   :  { %2003 = vmatprep.subr.bf16.mxu0 %v3061_v33  ;;  %v3103_v33 = vld [vmem:[%s3596_s3 + $0x124] ss:$8 sps:$4 sm:$0xff]  }
  0xe4   :  { %2004 = vmatpush1.bf16.msra.mxu0 %v3059_v0  ;;  %v274_v0 = vrot.slane %v3433_v13, %v273_v31 }
  0xe5   :  { %2573 = vmatmul.mubr.msk.bf16.vlgmr.msra.gmra.mrb[4].mxu1 %vm1259_vm0, %v3263_v10  ;;  %2005 = vmatprep.subr.bf16.mxu0 %v3064_v34  ;;  %v3070_v10 = vld [vmem:[%s3596_s3 + $0x74] ss:$8 sps:$4 sm:$0xff]   ;;  %v3101_v34 = vld [vmem:[%s3596_s3 + $0x120] ss:$8 sps:$4 sm:$0xff]  }
  0xe6   :  { %2665 = vmatpush3.bf16.msra.mxu1 %v3144_v61  ;;  %v269_v61 = vsub.s32 2, %v3427_v11  ;;  %v3160_v11 = vld [vmem:[%s3600_s7 + $0x8] sm:$0xff]  }
  0xe7   :  { %2666 = vmatprep.subr.bf16.mxu1 %v3145_v62  ;;  %v3136_v62 = vld [vmem:[%s3596_s3 + $0x1d4] ss:$8 sps:$4 sm:$0xff]  }
  0xe8   :  { %2006 = vmatpush1.bf16.msra.mxu0 %v3062_v35 }
  0xe9   :  { %2007 = vmatprep.subr.bf16.mxu0 %v3067_v36  ;;  %v3106_v36 = vld [vmem:[%s3596_s3 + $0x134] ss:$8 sps:$4 sm:$0xff]  }
  0xea   :  { %2667 = vmatpush3.bf16.msra.mxu1 %v3146_v63  ;;  %v3134_v63 = vld [vmem:[%s3596_s3 + $0x1d0] ss:$8 sps:$4 sm:$0xff]  }
  0xeb   :  { %2668 = vmatprep.subr.bf16.mxu1 %v3147_v1  ;;  %v270_v1 = vrot.slane %v3433_v13, %v269_v61  ;;  %v3156_v13 = vld [vmem:[%s3598_s5 + $0x30] sm:$0xff]  }
  0xec   :  { %v3333_v38 = vpop.f32.mrb[0].mxu1  ;;  %2008 = vmatpush1.bf16.msra.mxu0 %v3065_v37 }
  0xed   :  { %v3335_v39 = vpop.f32.mrb[1].mxu1  ;;  %2009 = vmatprep.subr.bf16.mxu0 %v3070_v10 }
  0xee   :  { %v1424_v41 = vpop.f32.mrb[2].mxu1  ;;  %2669 = vmatpush3.bf16.msra.mxu1 %v3148_v2  ;;  %v3139_v2 = vld [vmem:[%s3596_s3 + $0x1e4] ss:$8 sps:$4 sm:$0xff]  }
  0xef   :  { %v1425_v43 = vpop.f32.mrb[3].mxu1  ;;  %2670 = vmatprep.subr.bf16.mxu1 %v3149_v3  ;;  %v3137_v3 = vld [vmem:[%s3596_s3 + $0x1e0] ss:$8 sps:$4 sm:$0xff]  }
  0xf0   :  { %2010 = vmatpush1.bf16.msra.mxu0 %v3068_v40  ;;  %v3104_v40 = vld [vmem:[%s3596_s3 + $0x130] ss:$8 sps:$4 sm:$0xff]  }
  0xf1   :  { %2011 = vmatprep.subr.bf16.mxu0 %v3073_v42  ;;  %v3109_v42 = vld [vmem:[%s3596_s3 + $0x144] ss:$8 sps:$4 sm:$0xff]  }
  0xf2   :  { %2671 = vmatpush3.bf16.msra.mxu1 %v3150_v4 }
  0xf3   :  { %2672 = vmatprep.subr.bf16.mxu1 %v3151_v5  ;;  %v3142_v5 = vld [vmem:[%s3596_s3 + $0x1f4] ss:$8 sps:$4 sm:$0xff]  }
  0xf4   :  { %2012 = vmatpush1.bf16.msra.mxu0 %v3071_v44  ;;  %v3107_v44 = vld [vmem:[%s3596_s3 + $0x140] ss:$8 sps:$4 sm:$0xff]  }
  0xf5   :  { %2013 = vmatprep.subr.bf16.mxu0 %v3076_v45  ;;  %v3112_v45 = vld [vmem:[%s3596_s3 + $0x154] ss:$8 sps:$4 sm:$0xff]  }
  0xf6   :  { %2673 = vmatpush3.bf16.msra.mxu1 %v3152_v6  ;;  %v3140_v6 = vld [vmem:[%s3596_s3 + $0x1f0] ss:$8 sps:$4 sm:$0xff]  }
  0xf7   :  { %2674 = vmatprep.subr.bf16.mxu1 %v3153_v7 }
  0xf8   :  { %2014 = vmatpush1.bf16.msra.mxu0 %v3074_v46  ;;  %v3110_v46 = vld [vmem:[%s3596_s3 + $0x150] ss:$8 sps:$4 sm:$0xff]  }
  0xf9   :  { %2015 = vmatprep.subr.bf16.mxu0 %v3079_v47  ;;  %v3115_v47 = vld [vmem:[%s3596_s3 + $0x164] ss:$8 sps:$4 sm:$0xff]  }
  0xfa   :  { %2675 = vmatpush3.bf16.msra.mxu1 %v3154_v8 }
  0xfb   :  { %2676 = vmatprep.subr.bf16.mxu1 %v3155_v9 }
  0xfc   :  { %2016 = vmatpush1.bf16.msra.mxu0 %v3077_v48  ;;  %v3113_v48 = vld [vmem:[%s3596_s3 + $0x160] ss:$8 sps:$4 sm:$0xff]  }
  0xfd   :  { %2017 = vmatprep.subr.bf16.mxu0 %v3082_v49  ;;  %v3118_v49 = vld [vmem:[%s3596_s3 + $0x174] ss:$8 sps:$4 sm:$0xff]  }
  0xfe   :  { %2677 = vmatpush3.bf16.msra.mxu1 %v3156_v13 }
 0x100   :  { %2018 = vmatpush1.bf16.msra.mxu0 %v3080_v50  ;;  %v3116_v50 = vld [vmem:[%s3596_s3 + $0x170] ss:$8 sps:$4 sm:$0xff]  }
 0x101   :  { %2019 = vmatprep.subr.bf16.mxu0 %v3085_v51  ;;  %v3121_v51 = vld [vmem:[%s3596_s3 + $0x184] ss:$8 sps:$4 sm:$0xff]  }
 0x104   :  { %2020 = vmatpush1.bf16.msra.mxu0 %v3083_v52  ;;  %v3119_v52 = vld [vmem:[%s3596_s3 + $0x180] ss:$8 sps:$4 sm:$0xff]  }
 0x105   :  { %2021 = vmatprep.subr.bf16.mxu0 %v3088_v53  ;;  %v3124_v53 = vld [vmem:[%s3596_s3 + $0x194] ss:$8 sps:$4 sm:$0xff]  }
 0x108   :  { %2022 = vmatpush1.bf16.msra.mxu0 %v3086_v54  ;;  %v3122_v54 = vld [vmem:[%s3596_s3 + $0x190] ss:$8 sps:$4 sm:$0xff]  }
 0x109   :  { %2023 = vmatprep.subr.bf16.mxu0 %v3091_v55  ;;  %v3127_v55 = vld [vmem:[%s3596_s3 + $0x1a4] ss:$8 sps:$4 sm:$0xff]  }
 0x10c   :  { %2024 = vmatpush1.bf16.msra.mxu0 %v3089_v56  ;;  %v3125_v56 = vld [vmem:[%s3596_s3 + $0x1a0] ss:$8 sps:$4 sm:$0xff]  }
 0x10d   :  { %2025 = vmatprep.subr.bf16.mxu0 %v3094_v57  ;;  %v3130_v57 = vld [vmem:[%s3596_s3 + $0x1b4] ss:$8 sps:$4 sm:$0xff]  }
 0x110   :  { %2026 = vmatpush1.bf16.msra.mxu0 %v3092_v58  ;;  %v3128_v58 = vld [vmem:[%s3596_s3 + $0x1b0] ss:$8 sps:$4 sm:$0xff]  }
 0x111   :  { %2036 = vmatprep.subr.bf16.mxu0 %v3097_v59  ;;  %v3133_v59 = vld [vmem:[%s3596_s3 + $0x1c4] ss:$8 sps:$4 sm:$0xff]  }
 0x1a6   :  { %v1379_v17 = vpop.f32.mrb[0].mxu0 }
 0x1a7   :  { %v2715_v18 = vadd.f32 %v1379_v17, %v262_v15  ;;  %v1381_v19 = vpop.f32.mrb[1].mxu0  ;;  %v3157_v15 = vld [vmem:[%s3598_s5 + $0x78] sm:$0xff]   ;;  %v3195_v17 = vmov 0.0  }
 0x1a8   :  { %v2717_v20 = vadd.f32 %v1381_v19, %v266_v16  ;;  %v1383_v21 = vpop.f32.mrb[2].mxu0  ;;  %v3158_v16 = vld [vmem:[%s3598_s5 + $0x38] sm:$0xff]   ;;  %2678 = vmatprep.subr.bf16.mxu1 %v3157_v15 }
 0x1a9   :  { %v2716_v22 = vadd.f32 %v2715_v18, %v3333_v38  ;;  %v1384_v23 = vpop.f32.mrb[3].mxu0  ;;  %2679 = vmatpush3.bf16.msra.mxu1 %v3158_v16  ;;  %v1663_v18 = vld [vmem:[%s3597_s4] sm:$0x3] }
 0x1aa   :  { %v2718_v24 = vadd.f32 %v2717_v20, %v3335_v39  ;;  %2695 = vmatprep.subr.bf16.mxu1 %v3195_v17  ;;  %v1668_v19 = vrot.slane %v1663_v18, %v261_v12  ;;  %v1672_v20 = vrot.slane %v1663_v18, %v265_v14  ;;  %v3161_v12 = vld [vmem:[%s3600_s7 + $0x10] sm:$0xff]   ;;  %v3162_v14 = vld [vmem:[%s3600_s7 + $0x18] sm:$0xff]  }
 0x1ab   :  { %v1591_v25 = vmax.f32 %v2716_v22, 0.0 }
 0x1ac   :  { %v1592_v26 = vmax.f32 %v2718_v24, 0.0 }
 0x1ad   :  { %v1595_v29 = vpack.c.bf16 %v1591_v25, %v1591_v25 }
 0x1ae   :  { %v1596_v27 = vpack.c.bf16 %v1592_v26, %v1592_v26 }
 0x1b0   :  { %2027 = vmatprep.mubr.bf16.mxu0 %v1596_v27 }
 0x1b1   :  { %2028 = vmatmul.mubr.bf16.vlgmr.msra.gmra.mrb[4].mxu0 %v1595_v29 }
 0x1b2   :  { %2037 = vmatpush1.bf16.msra.mxu0 %v3095_v28 }
 0x1b3   :  { %2038 = vmatprep.subr.bf16.mxu0 %v3100_v30  ;;  %v3159_v30 = vld [vmem:[%s3600_s7] sm:$0xff]  }
 0x1b6   :  { %2039 = vmatpush1.bf16.msra.mxu0 %v3098_v32  ;;  %v3163_v32 = vld [vmem:[%s3600_s7 + $0x20] sm:$0xff]  }
 0x1b7   :  { %2040 = vmatprep.subr.bf16.mxu0 %v3103_v33  ;;  %v3164_v33 = vld [vmem:[%s3600_s7 + $0x28] sm:$0xff]  }
 0x1b8   :  { %v1584_v35 = vpop.f32.mrb[4].mxu1 }
 0x1b9   :  { %v1586_v37 = vpop.f32.mrb[5].mxu1  ;;  %v2719_v4 = vadd.f32 %v1584_v35, %v270_v1 }
 0x1ba   :  { %v2720_v10 = vadd.f32 %v1586_v37, %v274_v0  ;;  %v1588_v38 = vpop.f32.mrb[6].mxu1  ;;  %2041 = vmatpush1.bf16.msra.mxu0 %v3101_v34  ;;  %v3165_v0 = vld [vmem:[%s3600_s7 + $0x30] sm:$0xff]   ;;  %v3166_v34 = vld [vmem:[%s3600_s7 + $0x38] sm:$0xff]  }
 0x1bb   :  { %v1589_v39 = vpop.f32.mrb[7].mxu1  ;;  %2042 = vmatprep.subr.bf16.mxu0 %v3106_v36  ;;  %v1593_v7 = vmax.f32 %v2719_v4, 0.0  ;;  %v2638_v36 = vld [vmem:[%s3599_s6] ss:$0 sm:$0xff] }
 0x1bc   :  { %v1594_v41 = vmax.f32 %v2720_v10, 0.0 }
 0x1bd   :  { %v1597_v8 = vpack.c.bf16 %v1593_v7, %v1593_v7 }
 0x1be   :  { %v1598_v43 = vpack.c.bf16 %v1594_v41, %v1594_v41  ;;  %2043 = vmatpush1.bf16.msra.mxu0 %v3104_v40 }
 0x1bf   :  { %2044 = vmatprep.subr.bf16.mxu0 %v3109_v42 }
 0x1c0   :  { %2068 = vmatprep.mubr.bf16.mxu0 %v1598_v43  ;;  %v2655_v43 = vld [vmem:[%s3601_s8] ss:$0 sm:$0xff] }
 0x1c2   :  { %2045 = vmatpush1.bf16.msra.mxu0 %v3107_v44 }
 0x1c3   :  { %2046 = vmatprep.subr.bf16.mxu0 %v3112_v45 }
 0x1c6   :  { %2047 = vmatpush1.bf16.msra.mxu0 %v3110_v46 }
 0x1c7   :  { %2048 = vmatprep.subr.bf16.mxu0 %v3115_v47 }
 0x1ca   :  { %2049 = vmatpush1.bf16.msra.mxu0 %v3113_v48 }
 0x1cb   :  { %2050 = vmatprep.subr.bf16.mxu0 %v3118_v49 }
 0x1ce   :  { %2051 = vmatpush1.bf16.msra.mxu0 %v3116_v50 }
 0x1cf   :  { %2052 = vmatprep.subr.bf16.mxu0 %v3121_v51 }
 0x1d2   :  { %2053 = vmatpush1.bf16.msra.mxu0 %v3119_v52 }
 0x1d3   :  { %2054 = vmatprep.subr.bf16.mxu0 %v3124_v53 }
 0x1d6   :  { %2055 = vmatpush1.bf16.msra.mxu0 %v3122_v54 }
 0x1d7   :  { %2056 = vmatprep.subr.bf16.mxu0 %v3127_v55 }
 0x1da   :  { %2057 = vmatpush1.bf16.msra.mxu0 %v3125_v56 }
 0x1db   :  { %2058 = vmatprep.subr.bf16.mxu0 %v3130_v57 }
 0x1de   :  { %2059 = vmatpush1.bf16.msra.mxu0 %v3128_v58 }
 0x1df   :  { %2060 = vmatprep.subr.bf16.mxu0 %v3133_v59 }
 0x1e2   :  { %2061 = vmatpush1.bf16.msra.mxu0 %v3131_v60 }
 0x1e3   :  { %2062 = vmatprep.subr.bf16.mxu0 %v3136_v62 }
 0x1e6   :  { %2063 = vmatpush1.bf16.msra.mxu0 %v3134_v63 }
 0x1e7   :  { %2064 = vmatprep.subr.bf16.mxu0 %v3139_v2 }
 0x1ea   :  { %2065 = vmatpush1.bf16.msra.mxu0 %v3137_v3 }
 0x1eb   :  { %2066 = vmatprep.subr.bf16.mxu0 %v3142_v5 }
 0x1ee   :  { %2067 = vmatpush1.bf16.msra.mxu0 %v3140_v6 }
 0x1f1   :  { %2069 = vmatmul.mubr.bf16.vlgmr.msra.gmra.mrb[4].mxu0 %v1597_v8 }
 0x2c4   :  { %v2070_v21 = vpop.f32.mrb[4].mxu0 }
 0x2c5   :  { %v2721_v22 = vadd.f32 %v2070_v21, %v1668_v19  ;;  %v2072_v23 = vpop.f32.mrb[5].mxu0 }
 0x2c6   :  { %v2722_v24 = vadd.f32 %v2072_v23, %v1672_v20  ;;  %v2074_v25 = vpop.f32.mrb[6].mxu0 }
 0x2c7   :  { %v2077_v26 = vmax.f32 %v2721_v22, 0.0  ;;  %v2075_v27 = vpop.f32.mrb[7].mxu0 }
 0x2c8   :  { %v2078_v28 = vmax.f32 %v2722_v24, 0.0 }
 0x2c9   :  { %v2079_v31 = vpack.c.bf16 %v2077_v26, %v2077_v26 }
 0x2ca   :  { %v2080_v29 = vpack.c.bf16 %v2078_v28, %v2078_v28 }
 0x2cc   :  { %2248 = vmatprep.mubr.bf16.mxu1 %v2080_v29 }
 0x2cd   :  { %2249 = vmatmul.mubr.bf16.vlgmr.msra.gmra.mrb[8].mxu1 %v2079_v31 }
 0x2ce   :  { %2696 = vmatpush3.bf16.msra.mxu1 %v3159_v30  ;;  %2711 = vmatprep.mubr.msk.bf16.mxu1 %vm3196_vm1, %v3195_v17 }
 0x2cf   :  { %2697 = vmatprep.subr.bf16.mxu1 %v3195_v17 }
 0x2d2   :  { %2698 = vmatpush3.bf16.msra.mxu1 %v3160_v11 }
 0x2d3   :  { %2699 = vmatprep.subr.bf16.mxu1 %v3195_v17 }
 0x2d6   :  { %2700 = vmatpush3.bf16.msra.mxu1 %v3161_v12 }
 0x2d7   :  { %2701 = vmatprep.subr.bf16.mxu1 %v3195_v17 }
 0x2da   :  { %2702 = vmatpush3.bf16.msra.mxu1 %v3162_v14 }
 0x2db   :  { %2703 = vmatprep.subr.bf16.mxu1 %v3195_v17 }
 0x2de   :  { %2704 = vmatpush3.bf16.msra.mxu1 %v3163_v32 }
 0x2df   :  { %2705 = vmatprep.subr.bf16.mxu1 %v3195_v17 }
 0x2e2   :  { %2706 = vmatpush3.bf16.msra.mxu1 %v3164_v33 }
 0x2e3   :  { %2707 = vmatprep.subr.bf16.mxu1 %v3195_v17 }
 0x2e6   :  { %2708 = vmatpush3.bf16.msra.mxu1 %v3165_v0 }
 0x2e7   :  { %2709 = vmatprep.subr.bf16.mxu1 %v3195_v17 }
 0x2ea   :  { %2710 = vmatpush3.bf16.msra.mxu1 %v3166_v34 }
 0x3a0   :  { %v2680_v35 = vpop.f32.mrb[8].mxu1 }
 0x3a1   :  { %v2681_v37 = vpop.f32.mrb[9].mxu1 }
 0x3a2   :  { %v2682_v10 = vadd.f32 %v2681_v37, %v2680_v35  ;;  %v2683_v38 = vpop.f32.mrb[10].mxu1 }
 0x3a3   :  { %v2684_v39 = vpop.f32.mrb[11].mxu1 }
 0x3a4   :  { %v2251_v40 = vadd.f32 %v2682_v10, %v2638_v36 }
 0x3a6   :  { %v2256_v41 = vmax.f32 %v2251_v40, 0.0 }
 0x3a8   :  { %v2257_v42 = vpack.c.bf16 %v2256_v41, %v2256_v41 }
 0x3aa   :  { %2712 = vmatmul.mubr.bf16.vlgmr.msra.gmra.mrb[12].mxu1 %v2257_v42 }
 0x47d   :  { %v2363_v44 = vpop.f32.mrb[12].mxu1 }
 0x47e   :  { %v2364_v45 = vadd.f32 %v2655_v43, %v2363_v44  ;;  %v2713_v46 = vpop.f32.mrb[13].mxu1 }
 0x47f   :  { %v2366_v47 = vpop.f32.mrb[14].mxu1 }
 0x480   :  { %v2369_v48 = vpack.c.bf16 %v2364_v45, %v2364_v45  ;;  %v2714_v49 = vpop.f32.mrb[15].mxu1 }
 0x482   :  { %2370 = vst [vmem:[%s3602_s9] sm:$0xf] %v2369_v48 }
 0x483   :  { %2375 = vsyncpa [#allocation3], 1 }

</bundles_post_ra>
